<compile_context>
chip_gen: v5e
topology: v5e:2x2
jax: 0.10.0
libtpu: 0.0.40
codegen_flags: <defaults>
</compile_context>

<pallas_src>
import jax
import jax.numpy as jnp
from jax.experimental import pallas as pl
from jax.experimental.pallas import tpu as pltpu

HIDDEN = 128      # fc1 output width (nn.Linear(state_dim, 128))
STATE_PAD = 8     # fc1 contraction dim padded to one sublane group
ACT_PAD = 8       # fc2 output rows (actions) padded to one sublane group
_NEG_BIG = float(jnp.finfo(jnp.float32).min)   # explicit softmax pad sentinel


def _round_up(a, m):
    return ((a + m - 1) // m) * m


def policy_kernel(xt_ref, w1t_ref, b1_ref, w2t_ref, b2_ref, o_ref):
    """Feature-major tile: batch on the lane axis.

    xt_ref  : [STATE_PAD, TB]    zero-padded transposed states
    w1t_ref : [HIDDEN, STATE_PAD]
    b1_ref  : [HIDDEN, 1]
    w2t_ref : [ACT_PAD, HIDDEN]  (padded action rows are all-zero)
    b2_ref  : [ACT_PAD, 1]       (padded action rows carry finfo.min)
    o_ref   : [ACT_PAD, TB]
    """
    # fc1 on the MXU: [128, 8] @ [8, TB] -> [128, TB]; bias broadcast over lanes.
    h = jnp.dot(w1t_ref[...], xt_ref[...], preferred_element_type=jnp.float32)
    h = jnp.maximum(h + b1_ref[...], 0.0)

    # fc2 on the MXU: [8, 128] @ [128, TB] -> [8, TB]  (K=128, N=TB fills MXU).
    logits = jnp.dot(w2t_ref[...], h,
                     preferred_element_type=jnp.float32) + b2_ref[...]

    # Numerically stable softmax over the (padded) action / sublane axis.
    m = jnp.max(logits, axis=0, keepdims=True)          # [1, TB]
    e = jnp.exp(logits - m)                              # padded rows -> exactly 0
    denom = jnp.sum(e, axis=0, keepdims=True)            # [1, TB]
    inv = pl.reciprocal(denom, approx=True)              # EUP slot
    inv = inv * (2.0 - denom * inv)                      # 1 Newton step: ~2^-28 rel err
    o_ref[...] = (e * inv).astype(o_ref.dtype)


def pack_params(w1, b1, w2, b2):
    """One-time conversion of nn.Linear-style params into the kernel's padded,
    feature-major layout (hoisted out of the forward; no per-call pad ops)."""
    state_dim, hidden = w1.shape
    _, action_dim = w2.shape
    assert hidden == HIDDEN and w2.shape[0] == HIDDEN
    assert state_dim <= STATE_PAD and action_dim <= ACT_PAD
    w1t = jnp.pad(w1.T.astype(jnp.float32),
                  ((0, 0), (0, STATE_PAD - state_dim)))                    # [128, 8]
    b1c = b1.astype(jnp.float32).reshape(HIDDEN, 1)                        # [128, 1]
    w2t = jnp.pad(w2.T.astype(jnp.float32),
                  ((0, ACT_PAD - action_dim), (0, 0)))                     # [8, 128]
    b2c = jnp.pad(b2.astype(jnp.float32).reshape(action_dim, 1),
                  ((0, ACT_PAD - action_dim), (0, 0)),
                  constant_values=_NEG_BIG)                                # [8, 1]
    return {"w1t": w1t, "b1c": b1c, "w2t": w2t, "b2c": b2c,
            "state_dim": state_dim, "action_dim": action_dim}


def policy_forward(x, params, *, block_b=2048):
    """x: [B, state_dim] -> action probabilities [B, action_dim]."""
    B, state_dim = x.shape
    assert state_dim == params["state_dim"]
    action_dim = params["action_dim"]

    # Batch tile on the lane axis: multiple of 128 lanes; prefer >= 2 grid
    # steps when the batch permits (v7x dual-TC sharding + pipeline overlap).
    b128 = _round_up(B, 128)
    tb = min(block_b, b128)
    if b128 >= 256:
        tb = min(tb, max(128, _round_up(pl.cdiv(B, 2), 128)))
    bp = pl.cdiv(B, tb) * tb
    nsteps = bp // tb

    # Feature-major x: [STATE_PAD, bp]; one pad op covers both the K rows and
    # the batch tail (padded columns are sliced off below).
    xt = jnp.pad(x.T.astype(jnp.float32),
                 ((0, STATE_PAD - state_dim), (0, bp - B)))

    # Triple-buffer the batch-streamed arrays once there are enough steps to
    # hide writeback latency; per-buffer footprint is only 8*tb*4 bytes.
    buffered = pl.Buffered(3) if nsteps >= 3 else None

    def _spec(shape, imap, pipelined=False):
        if pipelined and buffered is not None:
            return pl.BlockSpec(shape, imap, pipeline_mode=buffered)
        return pl.BlockSpec(shape, imap)

    out = pl.pallas_call(
        policy_kernel,
        out_shape=jax.ShapeDtypeStruct((ACT_PAD, bp), jnp.float32),
        grid=(nsteps,),
        in_specs=[
            _spec((STATE_PAD, tb), lambda i: (0, i), pipelined=True),
            _spec((HIDDEN, STATE_PAD), lambda i: (0, 0)),
            _spec((HIDDEN, 1), lambda i: (0, 0)),
            _spec((ACT_PAD, HIDDEN), lambda i: (0, 0)),
            _spec((ACT_PAD, 1), lambda i: (0, 0)),
        ],
        out_specs=_spec((ACT_PAD, tb), lambda i: (0, i), pipelined=True),
        compiler_params=pltpu.CompilerParams(
            dimension_semantics=("parallel",)),  # batch tiles across v7x's 2 TCs
    )(xt, params["w1t"], params["b1c"], params["w2t"], params["b2c"])

    # Narrow slab written to HBM; the slice + transpose here are tiny.
    return out[:action_dim, :B].T


def init_params(key, state_dim, action_dim, hidden=HIDDEN):
    """Deterministic init mimicking nn.Linear's U(-1/sqrt(fan_in), 1/sqrt(fan_in))."""
    k1, k2, k3, k4 = jax.random.split(key, 4)
    bound1 = 1.0 / jnp.sqrt(state_dim)
    bound2 = 1.0 / jnp.sqrt(hidden)
    # stored pre-transposed: [in, out]
    w1 = jax.random.uniform(k1, (state_dim, hidden), jnp.float32, -bound1, bound1)
    b1 = jax.random.uniform(k2, (hidden,), jnp.float32, -bound1, bound1)
    w2 = jax.random.uniform(k3, (hidden, action_dim), jnp.float32, -bound2, bound2)
    b2 = jax.random.uniform(k4, (action_dim,), jnp.float32, -bound2, bound2)
    return w1, b1, w2, b2


if __name__ == "__main__":
    # CartPole-like dims: state_dim=4, action_dim=2, batch=8
    state_dim, action_dim, batch = 4, 2, 8

    key = jax.random.PRNGKey(0)
    kx, kp, kx2 = jax.random.split(key, 3)
    w1, b1, w2, b2 = init_params(kp, state_dim, action_dim)
    params = pack_params(w1, b1, w2, b2)   # hoisted: pad/transpose once

    def reference(xin):
        h = jnp.maximum(xin @ w1 + b1, 0.0)
        return jax.nn.softmax(h @ w2 + b2, axis=-1)

    # Small CartPole-like batch.
    x = jax.random.normal(kx, (batch, state_dim), jnp.float32)
    probs = jax.block_until_ready(policy_forward(x, params))
    assert probs.shape == (batch, action_dim)
    assert jnp.allclose(probs, reference(x), atol=1e-5, rtol=1e-5)
    assert jnp.allclose(jnp.sum(probs, axis=-1), 1.0, atol=1e-5)

    # Multi-tile batch (exercises grid > 1 and the padded batch tail).
    x2 = jax.random.normal(kx2, (300, state_dim), jnp.float32)
    probs2 = jax.block_until_ready(policy_forward(x2, params))
    assert probs2.shape == (300, action_dim)
    assert jnp.allclose(probs2, reference(x2), atol=1e-5, rtol=1e-5)

    print("KERNEL_OK")
</pallas_src>

<mosaic_0001>
module attributes {stable_mosaic.version = 11 : i64} {
  func.func @policy_kernel(%arg0: i32, %arg1: memref<8x128xf32, #tpu.memory_space<vmem>>, %arg2: memref<128x8xf32, #tpu.memory_space<vmem>>, %arg3: memref<128x1xf32, #tpu.memory_space<vmem>>, %arg4: memref<8x128xf32, #tpu.memory_space<vmem>>, %arg5: memref<8x1xf32, #tpu.memory_space<vmem>>, %arg6: memref<8x128xf32, #tpu.memory_space<vmem>>) attributes {dimension_semantics = [#tpu.dimension_semantics<parallel>], iteration_bounds = array<i64: 1>, scalar_prefetch = 0 : i64, scratch_operands = 0 : i64, tpu.core_type = #tpu.core_type<tc>, window_params = [{transform_indices = @transform_0, window_bounds = array<i64: 8, 128>}, {pipeline_mode = #tpu.pipeline_mode<synchronous>, transform_indices = @transform_1, window_bounds = array<i64: 128, 8>}, {pipeline_mode = #tpu.pipeline_mode<synchronous>, transform_indices = @transform_2, window_bounds = array<i64: 128, 1>}, {pipeline_mode = #tpu.pipeline_mode<synchronous>, transform_indices = @transform_3, window_bounds = array<i64: 8, 128>}, {pipeline_mode = #tpu.pipeline_mode<synchronous>, transform_indices = @transform_4, window_bounds = array<i64: 8, 1>}, {transform_indices = @transform_5, window_bounds = array<i64: 8, 128>}]} {
    %c0 = arith.constant 0 : index
    %c0_0 = arith.constant 0 : index
    %0 = vector.load %arg2[%c0, %c0_0] : memref<128x8xf32, #tpu.memory_space<vmem>>, vector<128x8xf32>
    %c0_1 = arith.constant 0 : index
    %c0_2 = arith.constant 0 : index
    %1 = vector.load %arg1[%c0_1, %c0_2] : memref<8x128xf32, #tpu.memory_space<vmem>>, vector<8x128xf32>
    %cst = arith.constant dense<0.000000e+00> : vector<128x128xf32>
    %2 = tpu.matmul %0, %1, %cst {dimension_numbers = #tpu.dot_dimension_numbers<[1], [0], [0], [1], [0, 0, 1, 1], [], []>} : vector<128x8xf32>, vector<8x128xf32>, vector<128x128xf32> -> vector<128x128xf32>
    %c0_3 = arith.constant 0 : index
    %c0_4 = arith.constant 0 : index
    %3 = vector.load %arg3[%c0_3, %c0_4] : memref<128x1xf32, #tpu.memory_space<vmem>>, vector<128x1xf32>
    %4 = vector.broadcast %3 : vector<128x1xf32> to vector<128x128xf32>
    %5 = arith.addf %2, %4 : vector<128x128xf32>
    %cst_5 = arith.constant 0.000000e+00 : f32
    %6 = vector.broadcast %cst_5 : f32 to vector<128x128xf32>
    %7 = arith.maximumf %5, %6 : vector<128x128xf32>
    %c0_6 = arith.constant 0 : index
    %c0_7 = arith.constant 0 : index
    %8 = vector.load %arg4[%c0_6, %c0_7] : memref<8x128xf32, #tpu.memory_space<vmem>>, vector<8x128xf32>
    %cst_8 = arith.constant dense<0.000000e+00> : vector<8x128xf32>
    %9 = tpu.matmul %8, %7, %cst_8 {dimension_numbers = #tpu.dot_dimension_numbers<[1], [0], [0], [1], [0, 0, 1, 1], [], []>} : vector<8x128xf32>, vector<128x128xf32>, vector<8x128xf32> -> vector<8x128xf32>
    %c0_9 = arith.constant 0 : index
    %c0_10 = arith.constant 0 : index
    %10 = vector.load %arg5[%c0_9, %c0_10] : memref<8x1xf32, #tpu.memory_space<vmem>>, vector<8x1xf32>
    %11 = vector.broadcast %10 : vector<8x1xf32> to vector<8x128xf32>
    %12 = arith.addf %9, %11 : vector<8x128xf32>
    %cst_11 = arith.constant dense<0xFF800000> : vector<128xf32>
    %13 = vector.multi_reduction <maximumf>, %12, %cst_11 [0] : vector<8x128xf32> to vector<128xf32>
    %14 = vector.shape_cast %13 : vector<128xf32> to vector<1x128xf32>
    %15 = vector.broadcast %14 : vector<1x128xf32> to vector<8x128xf32>
    %16 = arith.subf %12, %15 : vector<8x128xf32>
    %17 = math.exp %16 : vector<8x128xf32>
    %cst_12 = arith.constant dense<0.000000e+00> : vector<128xf32>
    %18 = vector.multi_reduction <add>, %17, %cst_12 [0] : vector<8x128xf32> to vector<128xf32>
    %19 = vector.shape_cast %18 : vector<128xf32> to vector<1x128xf32>
    %20 = tpu.reciprocal %19 {approx = true} : vector<1x128xf32> -> vector<1x128xf32>
    %21 = arith.mulf %19, %20 : vector<1x128xf32>
    %cst_13 = arith.constant 2.000000e+00 : f32
    %22 = vector.broadcast %cst_13 : f32 to vector<1x128xf32>
    %23 = arith.subf %22, %21 : vector<1x128xf32>
    %24 = arith.mulf %20, %23 : vector<1x128xf32>
    %25 = vector.broadcast %24 : vector<1x128xf32> to vector<8x128xf32>
    %26 = arith.mulf %17, %25 : vector<8x128xf32>
    %c0_14 = arith.constant 0 : index
    %c0_15 = arith.constant 0 : index
    %27 = vector.load %arg6[%c0_14, %c0_15] : memref<8x128xf32, #tpu.memory_space<vmem>>, vector<8x128xf32>
    tpu.vector_store %arg6[%c0_14, %c0_15], %26 {strides = array<i32>} : memref<8x128xf32, #tpu.memory_space<vmem>>, vector<8x128xf32>,
    return
  }
  func.func @transform_0(%arg0: i32) -> (i32, i32) {
    %c0_i32 = arith.constant 0 : i32
    %c0_i32_0 = arith.constant 0 : i32
    return %c0_i32, %arg0 : i32, i32
  }
  func.func @transform_1(%arg0: i32) -> (i32, i32) {
    %c0_i32 = arith.constant 0 : i32
    %c0_i32_0 = arith.constant 0 : i32
    %c0_i32_1 = arith.constant 0 : i32
    return %c0_i32, %c0_i32_0 : i32, i32
  }
  func.func @transform_2(%arg0: i32) -> (i32, i32) {
    %c0_i32 = arith.constant 0 : i32
    %c0_i32_0 = arith.constant 0 : i32
    %c0_i32_1 = arith.constant 0 : i32
    return %c0_i32, %c0_i32_0 : i32, i32
  }
  func.func @transform_3(%arg0: i32) -> (i32, i32) {
    %c0_i32 = arith.constant 0 : i32
    %c0_i32_0 = arith.constant 0 : i32
    %c0_i32_1 = arith.constant 0 : i32
    return %c0_i32, %c0_i32_0 : i32, i32
  }
  func.func @transform_4(%arg0: i32) -> (i32, i32) {
    %c0_i32 = arith.constant 0 : i32
    %c0_i32_0 = arith.constant 0 : i32
    %c0_i32_1 = arith.constant 0 : i32
    return %c0_i32, %c0_i32_0 : i32, i32
  }
  func.func @transform_5(%arg0: i32) -> (i32, i32) {
    %c0_i32 = arith.constant 0 : i32
    %c0_i32_0 = arith.constant 0 : i32
    return %c0_i32, %arg0 : i32, i32
  }
}

</mosaic_0001>

<bundles_post_ra>
// kernel: tpu_custom_call.1
= control target key start
LH: loop header
LB: loop body
LE: loop exit
PB: predicated region body
PF: predicated region fallthrough
CT: control target
= control target key end

     0   :  { %vm134_vm0 = vcmask 64512   ;;  %v381_v3 = vmov 0   ;;  %s543_s0 = inlined_call_operand.vmem [shape: f32[8,128], index: 0, kind: input, shape index: {}]   ;;  %s544_s1 = inlined_call_operand.vmem [shape: f32[128,8], index: 1, kind: input, shape index: {}]   ;;  %s545_s2 = inlined_call_operand.vmem [shape: f32[128,1], index: 2, kind: input, shape index: {}]   ;;  %s546_s3 = inlined_call_operand.vmem [shape: f32[8,128], index: 3, kind: input, shape index: {}]   ;;  %s547_s4 = inlined_call_operand.vmem [shape: f32[8,1], index: 4, kind: input, shape index: {}]   ;;  %s548_s5 = inlined_call_operand.hbm [shape: f32[8,128], index: 5, kind: output, shape index: {}]  }
   0x1   :  { %v37_v0 = vld [vmem:[%s543_s0] sm:$0xff]  ;;  %v53_v1 = vld [vmem:[%s545_s2 + $0x78] sm:$0xff]  ;;  %348 = vset.pattern.permute.xlu0 %v381_v3  ;;  %v27_v4 = vld [vmem:[%s544_s1 + $0x30] sm:$0xff]  ;;  %349 = vset.pattern.permute.xlu1 %v381_v3 }
   0x2   :  { %v21_v2 = vld [vmem:[%s544_s1] sm:$0xff]  ;;  %198 = vmatpush.msra.mxu0 %v37_v0  ;;  %344 = vmatpush.msra.mxu2 %v37_v0  ;;  %v51_v6 = vld [vmem:[%s545_s2 + $0x68] sm:$0xff]  ;;  %v49_v7 = vld [vmem:[%s545_s2 + $0x58] sm:$0xff] }
   0x3   :  { %v33_v5 = vld [vmem:[%s544_s1 + $0x60] sm:$0xff]  ;;  %345 = vmatpush.msra.mxu3 %v37_v0  ;;  %131 = vperm.xlu0 %348, %v53_v1   ;;  %v52_v8 = vld [vmem:[%s545_s2 + $0x70] sm:$0xff]  ;;  %v22_v9 = vld [vmem:[%s544_s1 + $0x8] sm:$0xff] }
   0x4   :  { %328 = vmatmul.msk.f32.vlgmr.msra.gmra.mxu0 %vm134_vm0, %v21_v2  ;;  %334 = vmatmul.msk.f32.vlgmr.msra.gmra.mxu2 %vm134_vm0, %v27_v4  ;;  %v28_v10 = vld [vmem:[%s544_s1 + $0x38] sm:$0xff]  ;;  %v34_v11 = vld [vmem:[%s544_s1 + $0x68] sm:$0xff] }
   0x5   :  { %340 = vmatmul.msk.f32.vlgmr.msra.gmra.mxu3 %vm134_vm0, %v33_v5  ;;  %350 = vset.pattern.permute.xlu2 %v381_v3 }
   0x6   :  { %121 = vperm.xlu1 %349, %v51_v6   ;;  %111 = vperm.xlu2 %350, %v49_v7  }
   0x7   :  { %10 = vsyncpa [#allocation3], 0  ;;  %v50_v12 = vld [vmem:[%s545_s2 + $0x60] sm:$0xff]  ;;  %v48_v13 = vld [vmem:[%s545_s2 + $0x50] sm:$0xff]  ;;  %s319_s10 = sshll.u32 %s548_s5, 4  ;;  %s320_s10 = int_to_ptr.hbm [resolvable:$true] %s319_s10 }
   0x8   :  { %v47_v14 = vld [vmem:[%s545_s2 + $0x48] sm:$0xff]  ;;  %v23_v15 = vld [vmem:[%s544_s1 + $0x10] sm:$0xff]  ;;  %v29_v16 = vld [vmem:[%s544_s1 + $0x40] sm:$0xff] }
   0x9   :  { %v35_v17 = vld [vmem:[%s544_s1 + $0x70] sm:$0xff]  ;;  %v46_v18 = vld [vmem:[%s545_s2 + $0x40] sm:$0xff]  ;;  %v45_v19 = vld [vmem:[%s545_s2 + $0x38] sm:$0xff] }
   0xa   :  { %v44_v20 = vld [vmem:[%s545_s2 + $0x30] sm:$0xff]  ;;  %v24_v21 = vld [vmem:[%s544_s1 + $0x18] sm:$0xff]  ;;  %v30_v22 = vld [vmem:[%s544_s1 + $0x48] sm:$0xff] }
   0xb   :  { %126 = vperm.xlu0 %348, %v52_v8   ;;  %v36_v23 = vld [vmem:[%s544_s1 + $0x78] sm:$0xff]  ;;  %v43_v24 = vld [vmem:[%s545_s2 + $0x28] sm:$0xff]  ;;  %v42_v25 = vld [vmem:[%s545_s2 + $0x20] sm:$0xff] }
   0xc   :  { %329 = vmatmul.msk.f32.gmra.mxu0 %vm134_vm0, %v22_v9  ;;  %335 = vmatmul.msk.f32.gmra.mxu2 %vm134_vm0, %v28_v10  ;;  %v41_v26 = vld [vmem:[%s545_s2 + $0x18] sm:$0xff]  ;;  %v25_v27 = vld [vmem:[%s544_s1 + $0x20] sm:$0xff]  ;;  %v31_v28 = vld [vmem:[%s544_s1 + $0x50] sm:$0xff] }
   0xd   :  { %341 = vmatmul.msk.f32.gmra.mxu3 %vm134_vm0, %v34_v11  ;;  %v40_v29 = vld [vmem:[%s545_s2 + $0x10] sm:$0xff]  ;;  %v39_v30 = vld [vmem:[%s545_s2 + $0x8] sm:$0xff]  ;;  %v38_v31 = vld [vmem:[%s545_s2] sm:$0xff] }
   0xe   :  { %116 = vperm.xlu1 %349, %v50_v12   ;;  %106 = vperm.xlu2 %350, %v48_v13   ;;  %v26_v32 = vld [vmem:[%s544_s1 + $0x28] sm:$0xff]  ;;  %v32_v33 = vld [vmem:[%s544_s1 + $0x58] sm:$0xff]  ;;  %v265_v34 = vld [vmem:[%s547_s4] sm:$0xff] }
  0x13   :  { %101 = vperm.xlu0 %348, %v47_v14  }
  0x14   :  { %330 = vmatmul.msk.f32.gmra.mxu0 %vm134_vm0, %v23_v15  ;;  %336 = vmatmul.msk.f32.gmra.mxu2 %vm134_vm0, %v29_v16 }
  0x15   :  { %342 = vmatmul.msk.f32.gmra.mxu3 %vm134_vm0, %v35_v17 }
  0x16   :  { %96 = vperm.xlu1 %349, %v46_v18   ;;  %91 = vperm.xlu2 %350, %v45_v19  }
  0x1b   :  { %86 = vperm.xlu0 %348, %v44_v20  }
  0x1c   :  { %331 = vmatmul.msk.f32.gmra.mxu0 %vm134_vm0, %v24_v21  ;;  %337 = vmatmul.msk.f32.gmra.mxu2 %vm134_vm0, %v30_v22 }
  0x1d   :  { %343 = vmatmul.msk.f32.gmra.mxu3 %vm134_vm0, %v36_v23 }
  0x1e   :  { %81 = vperm.xlu1 %349, %v43_v24   ;;  %76 = vperm.xlu2 %350, %v42_v25  }
  0x23   :  { %71 = vperm.xlu0 %348, %v41_v26  }
  0x24   :  { %332 = vmatmul.msk.f32.gmra.mxu0 %vm134_vm0, %v25_v27  ;;  %338 = vmatmul.msk.f32.gmra.mxu2 %vm134_vm0, %v31_v28 }
  0x26   :  { %66 = vperm.xlu1 %349, %v40_v29   ;;  %61 = vperm.xlu2 %350, %v39_v30  }
  0x2b   :  { %56 = vperm.xlu0 %348, %v38_v31  }
  0x2c   :  { %333 = vmatmul.msk.f32.gmra.mxu0 %vm134_vm0, %v26_v32  ;;  %339 = vmatmul.msk.f32.gmra.mxu2 %vm134_vm0, %v32_v33 }
  0x2e   :  { %268 = vperm.xlu1 %349, %v265_v34  }
  0x60   :  { %v112_v43 = vpop.permute.xlu2 %111 }
  0x68   :  { %v107_v53 = vpop.permute.xlu2 %106 }
  0x70   :  { %v92_v0 = vpop.permute.xlu2 %91 }
  0x75   :  { %v132_v38 = vpop.permute.xlu0 %131 }
  0x78   :  { %v122_v42 = vpop.permute.xlu1 %121  ;;  %v77_v11 = vpop.permute.xlu2 %76 }
  0x7d   :  { %v127_v46 = vpop.permute.xlu0 %126 }
  0x80   :  { %v117_v52 = vpop.permute.xlu1 %116  ;;  %v62_v25 = vpop.permute.xlu2 %61 }
  0x81   :  { %v531_v35 = vpop.f32.mrf.mxu0 }
  0x85   :  { %v102_v56 = vpop.permute.xlu0 %101 }
  0x87   :  { %v218_v36 = vpop.f32.mrf.mxu2 }
  0x88   :  { %v236_v37 = vpop.f32.mrf.mxu3  ;;  %v97_v63 = vpop.permute.xlu1 %96 }
  0x89   :  { %v533_v39 = vpop.f32.mrf.mxu0  ;;  %v237_v58 = vadd.f32 %v236_v37, %v117_v52 }
  0x8a   :  { %v204_v30 = vadd.f32 %v533_v39, %v62_v25 }
  0x8b   :  { %v260_v62 = vmax.f32 %v237_v58, 0.0 }
  0x8c   :  { %v249_v33 = vmax.f32 %v204_v30, 0.0 }
  0x8d   :  { %v87_v1 = vpop.permute.xlu0 %86 }
  0x8e   :  { %v219_v16 = vadd.f32 %v218_v36, %v87_v1  ;;  %v264_v36 = vld [vmem:[%s546_s3] sm:$0xff]  ;;  %s382_s3 = smov [#allocation2]  }
  0x8f   :  { %v221_v40 = vpop.f32.mrf.mxu2  ;;  %s317_s4 = sshll.u32 %s382_s3, 4  ;;  %s318_s4 = int_to_ptr.vmem [resolvable:$true] %s317_s4 }
  0x90   :  { %v239_v41 = vpop.f32.mrf.mxu3  ;;  %v82_v10 = vpop.permute.xlu1 %81  ;;  %v222_v12 = vadd.f32 %v221_v40, %v92_v0  ;;  %v254_v20 = vmax.f32 %v219_v16, 0.0 }
  0x91   :  { %v206_v47 = vpop.f32.mrf.mxu0  ;;  %v240_v54 = vadd.f32 %v239_v41, %v122_v42 }
  0x92   :  { %v255_v18 = vmax.f32 %v222_v12, 0.0 }
  0x93   :  { %v261_v60 = vmax.f32 %v240_v54, 0.0 }
  0x95   :  { %v72_v14 = vpop.permute.xlu0 %71 }
  0x97   :  { %v224_v44 = vpop.f32.mrf.mxu2 }
  0x98   :  { %v242_v45 = vpop.f32.mrf.mxu3  ;;  %v225_v8 = vadd.f32 %v224_v44, %v97_v63  ;;  %v67_v24 = vpop.permute.xlu1 %66 }
  0x99   :  { %v243_v50 = vadd.f32 %v242_v45, %v127_v46  ;;  %v209_v57 = vpop.f32.mrf.mxu0  ;;  %v207_v26 = vadd.f32 %v206_v47, %v67_v24 }
  0x9a   :  { %v256_v17 = vmax.f32 %v225_v8, 0.0  ;;  %v210_v22 = vadd.f32 %v209_v57, %v72_v14 }
  0x9b   :  { %v262_v59 = vmax.f32 %v243_v50, 0.0  ;;  %v250_v31 = vmax.f32 %v207_v26, 0.0 }
  0x9c   :  { %v251_v29 = vmax.f32 %v210_v22, 0.0 }
  0x9d   :  { %v57_v28 = vpop.permute.xlu0 %56 }
  0x9e   :  { %v201_v32 = vadd.f32 %v531_v35, %v57_v28 }
  0x9f   :  { %v227_v48 = vpop.f32.mrf.mxu2 }
  0xa0   :  { %v245_v49 = vpop.f32.mrf.mxu3  ;;  %v228_v6 = vadd.f32 %v227_v48, %v102_v56  ;;  %v248_v34 = vmax.f32 %v201_v32, 0.0  ;;  %v269_v37 = vpop.permute.xlu1 %268 }
  0xa1   :  { %v246_v51 = vadd.f32 %v245_v49, %v132_v38  ;;  %v212_v2 = vpop.f32.mrf.mxu0 }
  0xa2   :  { %v257_v13 = vmax.f32 %v228_v6, 0.0  ;;  %v213_v21 = vadd.f32 %v212_v2, %v77_v11 }
  0xa3   :  { %v263_v55 = vmax.f32 %v246_v51, 0.0 }
  0xa4   :  { %v252_v27 = vmax.f32 %v213_v21, 0.0 }
  0xa5   :  { %271 = vmatpush.msra.mxu1 %v263_v55 }
  0xa7   :  { %272 = vmatpush.msra.mxu1 %v262_v59  ;;  %v230_v61 = vpop.f32.mrf.mxu2 }
  0xa8   :  { %v231_v4 = vadd.f32 %v230_v61, %v107_v53 }
  0xa9   :  { %273 = vmatpush.msra.mxu1 %v261_v60  ;;  %v215_v15 = vpop.f32.mrf.mxu0 }
  0xaa   :  { %v258_v9 = vmax.f32 %v231_v4, 0.0  ;;  %v216_v19 = vadd.f32 %v215_v15, %v82_v10 }
  0xab   :  { %274 = vmatpush.msra.mxu1 %v260_v62 }
  0xac   :  { %v253_v23 = vmax.f32 %v216_v19, 0.0 }
  0xaf   :  { %v233_v3 = vpop.f32.mrf.mxu2 }
  0xb0   :  { %v234_v5 = vadd.f32 %v233_v3, %v112_v43 }
  0xb2   :  { %v259_v7 = vmax.f32 %v234_v5, 0.0 }
  0xb4   :  { %275 = vmatpush.msra.mxu1 %v259_v7 }
  0xb6   :  { %276 = vmatpush.msra.mxu1 %v258_v9 }
  0xb8   :  { %277 = vmatpush.msra.mxu1 %v257_v13 }
  0xba   :  { %278 = vmatpush.msra.mxu1 %v256_v17 }
  0xbc   :  { %279 = vmatpush.msra.mxu1 %v255_v18 }
  0xbe   :  { %280 = vmatpush.msra.mxu1 %v254_v20 }
  0xc0   :  { %281 = vmatpush.msra.mxu1 %v253_v23 }
  0xc2   :  { %282 = vmatpush.msra.mxu1 %v252_v27 }
  0xc4   :  { %283 = vmatpush.msra.mxu1 %v251_v29 }
  0xc6   :  { %284 = vmatpush.msra.mxu1 %v250_v31 }
  0xc8   :  { %285 = vmatpush.msra.mxu1 %v249_v33 }
  0xca   :  { %286 = vmatpush.msra.mxu1 %v248_v34 }
  0xcb   :  { %287 = vmatmul.f32.vlgmr.msra.gmra.mxu1 %v264_v36 }
 0x148   :  { %v288_v38 = vpop.f32.mrf.mxu1 }
 0x149   :  { %v289_v40 = vadd.f32 %v288_v38, %v269_v37 }
 0x14b   :  { %v291_v41 = vrot.slane %v289_v40, 4 }
 0x14d   :  { %v292_v39 = vmax.f32 %v289_v40, %v291_v41 }
 0x14f   :  { %v293_v42 = vrot.slane %v292_v39, 2 }
 0x151   :  { %v294_v43 = vmax.f32 %v292_v39, %v293_v42 }
 0x153   :  { %v295_v44 = vrot.slane %v294_v43, 1 }
 0x155   :  { %v296_v35 = vmax.f32 %v294_v43, %v295_v44 }
 0x157   :  { %v297_v45 = vsub.f32 %v289_v40, %v296_v35 }
 0x159   :  { %v298_v46 = vmul.f32 1.442695, %v297_v45 }
 0x15b   :  { %351 = vpow2.f32 %v298_v46 }
 0x161   :  { %v352_v47 = vpop.eup %351 }
 0x162   :  { %v300_v48 = vrot.slane %v352_v47, 4 }
 0x164   :  { %v301_v49 = vadd.f32 %v352_v47, %v300_v48 }
 0x166   :  { %v302_v50 = vrot.slane %v301_v49, 2 }
 0x168   :  { %v303_v51 = vadd.f32 %v302_v50, %v301_v49 }
 0x16a   :  { %v304_v52 = vrot.slane %v303_v51, 1 }
 0x16c   :  { %v305_v53 = vadd.f32 %v304_v52, %v303_v51 }
 0x16e   :  { %353 = vrcp.f32 %v305_v53 }
 0x174   :  { %v354_v54 = vpop.eup %353 }
 0x175   :  { %v307_v55 = vmul.f32 %v354_v54, %v305_v53 }
 0x177   :  { %v308_v56 = vsub.f32 2.0, %v307_v55 }
 0x179   :  { %v309_v57 = vmul.f32 %v354_v54, %v308_v56 }
 0x17b   :  { %v310_v58 = vmul.f32 %v352_v47, %v309_v57 }
 0x17d   :  { %311 = vst [vmem:[#allocation2] sm:$0xff] %v310_v58 }
 0x17e   :  { %322 = dma.vmem_to_hbm [thread:$0]  %s318_s4, 128, %s320_s10, [#allocation3]  }
 0x17f   :  { %379 = dma.done.wait [#allocation3], 128  }
 0x180   :  { %380 = vsyncadd [#allocation3], 4294967168 }
 0x181   :  { %327 = vsyncpa [#allocation3], 1 }

</bundles_post_ra>
